<compile_context>
chip_gen: v5e
topology: v5e:2x2
jax: 0.10.0
libtpu: 0.0.40
codegen_flags: <defaults>
</compile_context>

<pallas_src>
import functools
from math import sqrt

import jax
import jax.numpy as jnp
from jax import lax
from jax.experimental import pallas as pl
from jax.experimental.pallas import tpu as pltpu


def _round_up(x, m):
    return ((x + m - 1) // m) * m


def _largest_divisor(total, cap, step):
    """Largest multiple of `step` that divides `total` and is <= cap."""
    c = min(cap, total)
    c = max((c // step) * step, step)
    while c > step and total % c != 0:
        c -= step
    return c


def _choose_tiles(Mp, Np, Kp, caps=None):
    tm_cap, tn_cap, tk_cap = caps if caps is not None else (512, 512, 1024)
    # K tile: as big as possible (collapse the reduction axis when it fits).
    tk = _largest_divisor(Kp, tk_cap, 128)
    # N tile: prefer >= 2 N blocks when out_dim >= 256 so v7x's two TensorCores
    # each take half the weight; costs one ~0.35us extra step on 1-TC chips.
    tn_cap_eff = min(tn_cap, Np // 2) if Np >= 256 else tn_cap
    tn = _largest_divisor(Np, max(tn_cap_eff, 128), 128)
    # M tile: divisor of the (lightly) padded batch, multiple of 16.
    tm = _largest_divisor(Mp, tm_cap, 16)
    return tm, tn, tk


def _equal_linear_kernel(*refs, scale, activation, has_bias, nk):
    idx = 0
    x_ref = refs[idx]; idx += 1
    w_ref = refs[idx]; idx += 1
    b_ref = None
    if has_bias:
        b_ref = refs[idx]; idx += 1
    o_ref = refs[idx]; idx += 1
    acc_ref = refs[idx] if nk > 1 else None

    def epilogue(acc_f32):
        # Fold the scalar `scale` here (on the small output tile) instead of
        # scaling the full weight tile on the VPU.
        out = acc_f32 * jnp.float32(scale)
        if has_bias:
            out = out + b_ref[...]          # bias already carries lr_mul, f32
        if activation == "lrelu":
            # StyleGAN2 "fused_lrelu": leaky_relu(0.2) * sqrt(2)
            out = jnp.where(out >= 0.0, out, 0.2 * out) * jnp.float32(sqrt(2.0))
        elif callable(activation):
            out = activation(out)
        # TODO(synk): string activations other than "lrelu" are not mapped.
        o_ref[...] = out.astype(o_ref.dtype)

    # x tile [tm, tk] . w tile [tk, tn] -> [tm, tn]; weight was pre-transposed
    # in the wrapper so no in-kernel transpose, output lane dim = out_dim.
    partial = lax.dot_general(
        x_ref[...], w_ref[...],
        dimension_numbers=(((1,), (0,)), ((), ())),
        preferred_element_type=jnp.float32,
    )

    if nk == 1:
        # Single K step: skip the accumulator round-trip entirely.
        epilogue(partial)
    else:
        k = pl.program_id(2)

        @pl.when(k == 0)
        def _():
            acc_ref[...] = jnp.zeros_like(acc_ref)

        acc_ref[...] += partial

        @pl.when(k == nk - 1)
        def _():
            epilogue(acc_ref[...])


def prepare_equal_linear_params(weight, bias, *, lr_mul=1.0, mxu_dtype=jnp.bfloat16):
    """One-time weight/bias preprocessing (pad, cast to mxu_dtype, transpose)."""
    out_dim, in_dim = weight.shape
    Kp = _round_up(in_dim, 128)
    Np = _round_up(out_dim, 128)
    w_t = weight.astype(mxu_dtype).T                      # [in_dim, out_dim]
    if (Kp, Np) != (in_dim, out_dim):
        w_t = jnp.zeros((Kp, Np), mxu_dtype).at[:in_dim, :out_dim].set(w_t)
    if bias is not None:
        # Fold lr_mul into the tiny bias once; keep it f32 for accuracy.
        b_p = jnp.zeros((1, Np), jnp.float32).at[0, :out_dim].set(
            bias.astype(jnp.float32) * lr_mul)
    else:
        b_p = None
    return w_t, b_p, (in_dim, out_dim)


def equal_linear_prepared(x, w_t, b_p, *, in_dim, out_dim, lr_mul=1.0,
                          activation=None, mxu_dtype=jnp.bfloat16, tile_caps=None):
    B, in_dim_x = x.shape
    assert in_dim_x == in_dim, "weight/input dim mismatch"
    scale = 1.0 / sqrt(in_dim) * lr_mul
    Kp, Np = w_t.shape
    has_bias = b_p is not None

    # Pad batch only to the bf16 sublane group (16); lane dims already 128-pad.
    Mp = _round_up(B, 16)
    xp = x.astype(mxu_dtype)
    if (Mp, Kp) != (B, in_dim):
        xp = jnp.zeros((Mp, Kp), mxu_dtype).at[:B, :in_dim].set(xp)

    tm, tn, tk = _choose_tiles(Mp, Np, Kp, tile_caps)
    nk = Kp // tk

    in_specs = [
        pl.BlockSpec((tm, tk), lambda i, j, k: (i, k)),   # x tile
        pl.BlockSpec((tk, tn), lambda i, j, k: (k, j)),   # pre-transposed weight
    ]
    args = [xp, w_t]
    if has_bias:
        in_specs.append(pl.BlockSpec((1, tn), lambda i, j, k: (0, j)))
        args.append(b_p)

    scratch = [pltpu.VMEM((tm, tn), jnp.float32)] if nk > 1 else []

    kernel = functools.partial(
        _equal_linear_kernel,
        scale=scale, activation=activation, has_bias=has_bias, nk=nk)

    op_b = jnp.dtype(mxu_dtype).itemsize
    out_b = jnp.dtype(x.dtype).itemsize
    cost = pl.CostEstimate(
        flops=2 * Mp * Np * Kp,
        transcendentals=0,
        bytes_accessed=(Mp * Kp + Kp * Np) * op_b + Mp * Np * out_b
                       + (Np * 4 if has_bias else 0),
    )

    out_padded = pl.pallas_call(
        kernel,
        out_shape=jax.ShapeDtypeStruct((Mp, Np), x.dtype),
        grid_spec=pltpu.PrefetchScalarGridSpec(
            num_scalar_prefetch=0,
            grid=(Mp // tm, Np // tn, nk),
            in_specs=in_specs,
            out_specs=pl.BlockSpec((tm, tn), lambda i, j, k: (i, j)),
            scratch_shapes=scratch,
        ),
        compiler_params=pltpu.CompilerParams(
            dimension_semantics=("parallel", "parallel", "arbitrary"),
        ),
        cost_estimate=cost,
    )(*args)

    if (Mp, Np) != (B, out_dim):
        return out_padded[:B, :out_dim]
    return out_padded


def equal_linear(x, weight, bias, *, lr_mul=1.0, activation=None,
                 mxu_dtype=jnp.bfloat16, tile_caps=None):
    """Convenience wrapper: per-call weight prep + kernel call."""
    w_t, b_p, (in_dim, out_dim) = prepare_equal_linear_params(
        weight, bias, lr_mul=lr_mul, mxu_dtype=mxu_dtype)
    return equal_linear_prepared(
        x, w_t, b_p, in_dim=in_dim, out_dim=out_dim, lr_mul=lr_mul,
        activation=activation, mxu_dtype=mxu_dtype, tile_caps=tile_caps)


def make_equal_linear(weight, bias, *, lr_mul=1.0, activation=None,
                      mxu_dtype=jnp.bfloat16):
    """Hoists weight padding/cast/transpose out of the per-call path."""
    w_t, b_p, (in_dim, out_dim) = prepare_equal_linear_params(
        weight, bias, lr_mul=lr_mul, mxu_dtype=mxu_dtype)

    def fwd(x):
        return equal_linear_prepared(
            x, w_t, b_p, in_dim=in_dim, out_dim=out_dim, lr_mul=lr_mul,
            activation=activation, mxu_dtype=mxu_dtype)

    return fwd


if __name__ == "__main__":
    key = jax.random.PRNGKey(0)
    k_x, k_w, k_x2, k_w2 = jax.random.split(key, 4)

    # --- small case (B=8, 32 -> 32, lr_mul=0.5), exact f32 MXU path ---
    B, in_dim, out_dim = 8, 32, 32
    lr_mul = 0.5
    weight = jax.random.normal(k_w, (out_dim, in_dim), dtype=jnp.float32) / lr_mul
    bias = jnp.zeros((out_dim,), dtype=jnp.float32)
    x = jax.random.normal(k_x, (B, in_dim), dtype=jnp.float32)
    scale = 1.0 / sqrt(in_dim) * lr_mul
    ref_lin = x @ (weight * scale).T + bias * lr_mul

    out = jax.block_until_ready(
        equal_linear(x, weight, bias, lr_mul=lr_mul, mxu_dtype=jnp.float32))
    assert jnp.allclose(out, ref_lin, atol=1e-5, rtol=1e-5), "mismatch (linear f32)"

    out_act = jax.block_until_ready(
        equal_linear(x, weight, bias, lr_mul=lr_mul, activation="lrelu",
                     mxu_dtype=jnp.float32))
    ref_act = jnp.where(ref_lin >= 0, ref_lin, 0.2 * ref_lin) * sqrt(2.0)
    assert jnp.allclose(out_act, ref_act, atol=1e-5, rtol=1e-5), "mismatch (lrelu)"

    out_nb = jax.block_until_ready(
        equal_linear(x, weight, None, lr_mul=lr_mul, mxu_dtype=jnp.float32))
    assert jnp.allclose(out_nb, x @ (weight * scale).T, atol=1e-5, rtol=1e-5), \
        "mismatch (no bias)"

    # --- default bf16-MXU path (halved HBM bytes), loose tolerance ---
    out_bf = jax.block_until_ready(equal_linear(x, weight, bias, lr_mul=lr_mul))
    assert jnp.allclose(out_bf, ref_lin, atol=5e-2, rtol=5e-2), "mismatch (bf16)"

    # --- multi-K accumulator path (force tk=128 so Kp//tk = 2), exact f32 ---
    B3, D3 = 16, 256
    w3 = jax.random.normal(k_w2, (D3, D3), dtype=jnp.float32)
    b3 = jnp.full((D3,), 0.1, dtype=jnp.float32)
    x3 = jax.random.normal(k_x2, (B3, D3), dtype=jnp.float32)
    s3 = 1.0 / sqrt(D3)
    ref3 = x3 @ (w3 * s3).T + b3
    out3 = jax.block_until_ready(
        equal_linear(x3, w3, b3, mxu_dtype=jnp.float32, tile_caps=(512, 128, 128)))
    assert jnp.allclose(out3, ref3, atol=1e-4, rtol=1e-4), "mismatch (multi-K)"

    # --- StyleGAN mapping-net-like case, hoisted weight prep, bf16 default ---
    B2, D2 = 16, 512
    lr2 = 0.01
    w2 = jax.random.normal(k_w2, (D2, D2), dtype=jnp.float32) / lr2
    b2 = jnp.zeros((D2,), dtype=jnp.float32)
    x2 = jax.random.normal(k_x2, (B2, D2), dtype=jnp.float32)
    s2 = 1.0 / sqrt(D2) * lr2
    layer = make_equal_linear(w2, b2, lr_mul=lr2, activation="lrelu")
    out2 = jax.block_until_ready(layer(x2))
    lin2 = x2 @ (w2 * s2).T + b2 * lr2
    ref2 = jnp.where(lin2 >= 0, lin2, 0.2 * lin2) * sqrt(2.0)
    assert jnp.allclose(out2, ref2, atol=5e-2, rtol=5e-2), "mismatch (512-dim bf16)"

    print("KERNEL_OK")
</pallas_src>

<mosaic_0001>
module attributes {stable_mosaic.version = 11 : i64} {
  func.func @_equal_linear_kernel(%arg0: i32, %arg1: i32, %arg2: i32, %arg3: memref<16x128xf32, #tpu.memory_space<vmem>>, %arg4: memref<128x128xf32, #tpu.memory_space<vmem>>, %arg5: memref<1x128xf32, #tpu.memory_space<vmem>>, %arg6: memref<16x128xf32, #tpu.memory_space<vmem>>) attributes {dimension_semantics = [#tpu.dimension_semantics<parallel>, #tpu.dimension_semantics<parallel>, #tpu.dimension_semantics<arbitrary>], iteration_bounds = array<i64: 1, 1, 1>, scalar_prefetch = 0 : i64, scratch_operands = 0 : i64, tpu.core_type = #tpu.core_type<tc>, window_params = [{transform_indices = @transform_0, window_bounds = array<i64: 16, 128>}, {transform_indices = @transform_1, window_bounds = array<i64: 128, 128>}, {transform_indices = @transform_2, window_bounds = array<i64: 1, 128>}, {transform_indices = @transform_3, window_bounds = array<i64: 16, 128>}]} {
    %c0 = arith.constant 0 : index
    %c0_0 = arith.constant 0 : index
    %0 = vector.load %arg3[%c0, %c0_0] : memref<16x128xf32, #tpu.memory_space<vmem>>, vector<16x128xf32>
    %c0_1 = arith.constant 0 : index
    %c0_2 = arith.constant 0 : index
    %1 = vector.load %arg4[%c0_1, %c0_2] : memref<128x128xf32, #tpu.memory_space<vmem>>, vector<128x128xf32>
    %cst = arith.constant dense<0.000000e+00> : vector<16x128xf32>
    %2 = tpu.matmul %0, %1, %cst {dimension_numbers = #tpu.dot_dimension_numbers<[1], [0], [0], [1], [0, 0, 1, 1], [], []>} : vector<16x128xf32>, vector<128x128xf32>, vector<16x128xf32> -> vector<16x128xf32>
    %cst_3 = arith.constant 0.0883883461 : f32
    %3 = vector.broadcast %cst_3 : f32 to vector<16x128xf32>
    %4 = arith.mulf %2, %3 : vector<16x128xf32>
    %c0_4 = arith.constant 0 : index
    %c0_5 = arith.constant 0 : index
    %5 = vector.load %arg5[%c0_4, %c0_5] : memref<1x128xf32, #tpu.memory_space<vmem>>, vector<1x128xf32>
    %6 = vector.broadcast %5 : vector<1x128xf32> to vector<16x128xf32>
    %7 = arith.addf %4, %6 : vector<16x128xf32>
    %c0_6 = arith.constant 0 : index
    %c0_7 = arith.constant 0 : index
    %8 = vector.load %arg6[%c0_6, %c0_7] : memref<16x128xf32, #tpu.memory_space<vmem>>, vector<16x128xf32>
    tpu.vector_store %arg6[%c0_6, %c0_7], %7 {strides = array<i32>} : memref<16x128xf32, #tpu.memory_space<vmem>>, vector<16x128xf32>,
    return
  }
  func.func @transform_0(%arg0: i32, %arg1: i32, %arg2: i32) -> (i32, i32) {
    %c0_i32 = arith.constant 0 : i32
    return %arg0, %arg2 : i32, i32
  }
  func.func @transform_1(%arg0: i32, %arg1: i32, %arg2: i32) -> (i32, i32) {
    %c0_i32 = arith.constant 0 : i32
    return %arg2, %arg1 : i32, i32
  }
  func.func @transform_2(%arg0: i32, %arg1: i32, %arg2: i32) -> (i32, i32) {
    %c0_i32 = arith.constant 0 : i32
    %c0_i32_0 = arith.constant 0 : i32
    return %c0_i32, %arg1 : i32, i32
  }
  func.func @transform_3(%arg0: i32, %arg1: i32, %arg2: i32) -> (i32, i32) {
    %c0_i32 = arith.constant 0 : i32
    return %arg0, %arg1 : i32, i32
  }
}

</mosaic_0001>

<bundles_post_ra>
// kernel: tpu_custom_call.1
= control target key start
LH: loop header
LB: loop body
LE: loop exit
PB: predicated region body
PF: predicated region fallthrough
CT: control target
= control target key end

     0   :  { %8 = vsyncpa [#allocation3], 0  ;;  %s264_s0 = inlined_call_operand.hbm [shape: f32[16,128], index: 0, kind: input, shape index: {}]   ;;  %s265_s1 = inlined_call_operand.hbm [shape: f32[128,128], index: 1, kind: input, shape index: {}]   ;;  %s266_s2 = inlined_call_operand.vmem [shape: f32[1,128], index: 2, kind: input, shape index: {}]   ;;  %s267_s3 = inlined_call_operand.hbm [shape: f32[16,128], index: 3, kind: output, shape index: {}]  }
   0x1   :  { %9 = vsyncpa [#allocation6], 0 }
   0x2   :  { %10 = vsyncpa [#allocation4], 0  ;;  %s15_s14 = sshll.u32 %s264_s0, 4  ;;  %s218_s15 = smov [#allocation2]   ;;  %s16_s14 = int_to_ptr.hbm [resolvable:$true] %s15_s14 }
   0x3   :  { %s17_s16 = sshll.u32 %s218_s15, 4  ;;  %s28_s19 = sshll.u32 %s265_s1, 4  ;;  %s18_s16 = int_to_ptr.vmem [resolvable:$true] %s17_s16  ;;  %s29_s19 = int_to_ptr.hbm [resolvable:$true] %s28_s19 }
   0x4   :  { %s219_s20 = smov 128   ;;  %s220_s21 = smov 8  }
   0x5   :  { %23 = dma.hbm_to_vmem [thread:$0]  %s16_s14, 256, %s18_s16, [#allocation3], %s219_s20, %s219_s20, %s220_s21  }
   0x6   :  { %s221_s22 = smov [#allocation5]  }
   0x7   :  { %s30_s23 = sshll.u32 %s221_s22, 4  ;;  %s31_s23 = int_to_ptr.vmem [resolvable:$true] %s30_s23 }
   0x8   :  { %36 = dma.hbm_to_vmem [thread:$0]  %s29_s19, 2048, %s31_s23, [#allocation6], %s219_s20, %s219_s20, %s220_s21  }
   0x9   :  { %212 = dma.done.wait [#allocation3], 256  }
   0xa   :  { %213 = vsyncadd [#allocation3], 4294967040 }
   0xb   :  { %214 = dma.done.wait [#allocation6], 2048  }
   0xc   :  { %215 = vsyncadd [#allocation6], 4294965248  ;;  %v64_v0 = vld [vmem:[#allocation5 + $0x78] sm:$0xff]  ;;  %v63_v1 = vld [vmem:[#allocation5 + $0x70] sm:$0xff]  ;;  %s222_s24 = smov [#allocation7]   ;;  %s104_s28 = sshll.u32 %s267_s3, 4  ;;  %s105_s28 = int_to_ptr.hbm [resolvable:$true] %s104_s28 }
   0xd   :  { %65 = vmatpush.msra.mxu0 %v64_v0  ;;  %118 = vmatpush.msra.mxu1 %v64_v0  ;;  %v62_v2 = vld [vmem:[#allocation5 + $0x68] sm:$0xff]  ;;  %v61_v3 = vld [vmem:[#allocation5 + $0x60] sm:$0xff]  ;;  %v60_v4 = vld [vmem:[#allocation5 + $0x58] sm:$0xff]  ;;  %s102_s25 = sshll.u32 %s222_s24, 4  ;;  %s103_s25 = int_to_ptr.vmem [resolvable:$true] %s102_s25 }
   0xe   :  { %v59_v5 = vld [vmem:[#allocation5 + $0x50] sm:$0xff]  ;;  %v58_v6 = vld [vmem:[#allocation5 + $0x48] sm:$0xff]  ;;  %v57_v7 = vld [vmem:[#allocation5 + $0x40] sm:$0xff] }
   0xf   :  { %66 = vmatpush.msra.mxu0 %v63_v1  ;;  %119 = vmatpush.msra.mxu1 %v63_v1  ;;  %v56_v8 = vld [vmem:[#allocation5 + $0x38] sm:$0xff]  ;;  %v55_v9 = vld [vmem:[#allocation5 + $0x30] sm:$0xff]  ;;  %v54_v10 = vld [vmem:[#allocation5 + $0x28] sm:$0xff] }
  0x10   :  { %v53_v11 = vld [vmem:[#allocation5 + $0x20] sm:$0xff]  ;;  %v52_v12 = vld [vmem:[#allocation5 + $0x18] sm:$0xff]  ;;  %v51_v13 = vld [vmem:[#allocation5 + $0x10] sm:$0xff] }
  0x11   :  { %67 = vmatpush.msra.mxu0 %v62_v2  ;;  %120 = vmatpush.msra.mxu1 %v62_v2  ;;  %v50_v14 = vld [vmem:[#allocation5 + $0x8] sm:$0xff]  ;;  %v49_v15 = vld [vmem:[#allocation5] sm:$0xff]  ;;  %v47_v16 = vld [vmem:[#allocation2] sm:$0xff] }
  0x12   :  { %v48_v17 = vld [vmem:[#allocation2 + $0x8] sm:$0xff]  ;;  %v139_v18 = vld [vmem:[%s266_s2] ss:$0 sm:$0xff] }
  0x13   :  { %68 = vmatpush.msra.mxu0 %v61_v3  ;;  %121 = vmatpush.msra.mxu1 %v61_v3 }
  0x15   :  { %69 = vmatpush.msra.mxu0 %v60_v4  ;;  %122 = vmatpush.msra.mxu1 %v60_v4 }
  0x17   :  { %70 = vmatpush.msra.mxu0 %v59_v5  ;;  %123 = vmatpush.msra.mxu1 %v59_v5 }
  0x19   :  { %71 = vmatpush.msra.mxu0 %v58_v6  ;;  %124 = vmatpush.msra.mxu1 %v58_v6 }
  0x1b   :  { %72 = vmatpush.msra.mxu0 %v57_v7  ;;  %125 = vmatpush.msra.mxu1 %v57_v7 }
  0x1d   :  { %73 = vmatpush.msra.mxu0 %v56_v8  ;;  %126 = vmatpush.msra.mxu1 %v56_v8 }
  0x1f   :  { %74 = vmatpush.msra.mxu0 %v55_v9  ;;  %127 = vmatpush.msra.mxu1 %v55_v9 }
  0x21   :  { %75 = vmatpush.msra.mxu0 %v54_v10  ;;  %128 = vmatpush.msra.mxu1 %v54_v10 }
  0x23   :  { %76 = vmatpush.msra.mxu0 %v53_v11  ;;  %129 = vmatpush.msra.mxu1 %v53_v11 }
  0x25   :  { %77 = vmatpush.msra.mxu0 %v52_v12  ;;  %130 = vmatpush.msra.mxu1 %v52_v12 }
  0x27   :  { %78 = vmatpush.msra.mxu0 %v51_v13  ;;  %131 = vmatpush.msra.mxu1 %v51_v13 }
  0x29   :  { %79 = vmatpush.msra.mxu0 %v50_v14  ;;  %132 = vmatpush.msra.mxu1 %v50_v14 }
  0x2b   :  { %80 = vmatpush.msra.mxu0 %v49_v15  ;;  %133 = vmatpush.msra.mxu1 %v49_v15 }
  0x2c   :  { %81 = vmatmul.f32.vlgmr.msra.gmra.mxu0 %v47_v16  ;;  %84 = vmatmul.f32.vlgmr.msra.gmra.mxu1 %v48_v17 }
  0xa9   :  { %v82_v19 = vpop.f32.mrf.mxu0  ;;  %v85_v20 = vpop.f32.mrf.mxu1 }
  0xaa   :  { %v88_v21 = vmul.f32 0.088388346, %v82_v19  ;;  %v89_v22 = vmul.f32 0.088388346, %v85_v20 }
  0xac   :  { %v94_v23 = vadd.f32 %v139_v18, %v88_v21  ;;  %v95_v24 = vadd.f32 %v139_v18, %v89_v22 }
  0xae   :  { %96 = vst [vmem:[#allocation7] sm:$0xff] %v94_v23 }
  0xaf   :  { %97 = vst [vmem:[#allocation7 + $0x8] sm:$0xff] %v95_v24 }
  0xb0   :  { %110 = dma.vmem_to_hbm [thread:$0]  %s103_s25, 256, %s105_s28, [#allocation4], %s219_s20, %s219_s20, %s220_s21  }
  0xb1   :  { %216 = dma.done.wait [#allocation4], 256  }
  0xb2   :  { %217 = vsyncadd [#allocation4], 4294967040 }
  0xb3   :  { %115 = vsyncpa [#allocation3], 1 }
  0xb4   :  { %116 = vsyncpa [#allocation6], 1 }
  0xb5   :  { %117 = vsyncpa [#allocation4], 1 }

</bundles_post_ra>
